<compile_context>
chip_gen: v6e
topology: v6e:2x2x1
jax: 0.10.0
libtpu: 0.0.40
codegen_flags: <defaults>
</compile_context>

<pallas_src>
import jax
import jax.numpy as jnp
from jax.experimental import pallas as pl
from jax.experimental.pallas import tpu as pltpu


def _round_up(n, m):
    return ((n + m - 1) // m) * m


def _batch_tiling(B, block_batch):
    """Pick (tile_rows, padded_rows): tile is a multiple of 8 sublanes, capped
    at block_batch; use >= 2 grid steps when possible so v7x's second
    TensorCore gets work; padding stays < 8 rows per grid step."""
    if B <= 8:
        n_steps = 1
    else:
        n_steps = max(2, pl.cdiv(B, block_batch))
    tm = min(block_batch, _round_up(pl.cdiv(B, n_steps), 8))
    n_steps = pl.cdiv(B, tm)
    return tm, n_steps * tm


def clf_prepare_params(w1, b1, w2, b2):
    """One-time (per-model, NOT per-call) padding/casting of CLF parameters.

    Lane-pads only the N/output dims to multiples of 128, casts weights to
    bf16 for the MXU, keeps biases f32 for the VPU.  Padded lanes/rows are
    exactly zero so they stay zero through bias-add + ReLU."""
    int_dim = w1.shape[0]
    out_dim = w2.shape[1]
    D = _round_up(int_dim, 128)   # lane-padded hidden width
    O = _round_up(out_dim, 128)   # lane-padded output width

    w1p = jnp.zeros((int_dim, D), jnp.bfloat16).at[:, :int_dim].set(
        w1.astype(jnp.bfloat16))
    b1p = jnp.zeros((1, D), jnp.float32).at[:, :int_dim].set(
        b1.astype(jnp.float32).reshape(1, -1))
    # Second matmul contracts over the lane-padded hidden dim D; the padded
    # hidden lanes are exactly 0, so the zero rows [int_dim:D) of w2 are inert.
    w2p = jnp.zeros((D, O), jnp.bfloat16).at[:int_dim, :out_dim].set(
        w2.astype(jnp.bfloat16))
    b2p = jnp.zeros((1, O), jnp.float32).at[:, :out_dim].set(
        b2.astype(jnp.float32).reshape(1, -1))
    return w1p, b1p, w2p, b2p


def clf_kernel(x_ref, w1_ref, b1_ref, w2_ref, b2_ref, o_ref):
    # x_ref: (tm, int_dim) input dtype | w1_ref: (int_dim, D) bf16 | b1_ref: (1, D) f32
    # w2_ref: (D, O) bf16              | b2_ref: (1, O) f32        | o_ref: (tm, O)
    x = x_ref[...].astype(jnp.bfloat16)          # in-kernel cast (VPU filler)
    h = jnp.dot(x, w1_ref[...], preferred_element_type=jnp.float32)
    h = jnp.maximum(h + b1_ref[...], 0.0)        # bias + ReLU in f32 on the VPU
    y = jnp.dot(h.astype(jnp.bfloat16), w2_ref[...],
                preferred_element_type=jnp.float32)
    o_ref[...] = (y + b2_ref[...]).astype(o_ref.dtype)


def clf_forward(x, w1p, b1p, w2p, b2p, out_dim, *, block_batch=256):
    """x: (B, int_dim); padded params from clf_prepare_params -> (B, out_dim)."""
    B, int_dim = x.shape
    assert w1p.shape[0] == int_dim
    D = w1p.shape[1]
    O = w2p.shape[1]

    tm, Bp = _batch_tiling(B, block_batch)
    xp = x if Bp == B else jnp.pad(x, ((0, Bp - B), (0, 0)))

    # Rough resident-VMEM estimate: single-buffered weights/biases, double-
    # buffered x/out tiles, plus the f32 hidden intermediate.
    itemsize = jnp.dtype(x.dtype).itemsize
    weight_bytes = (w1p.size + w2p.size) * 2 + (b1p.size + b2p.size) * 4
    tile_bytes = 2 * tm * int_dim * itemsize + 2 * tm * O * itemsize + tm * D * 4
    vmem_limit = None
    if weight_bytes + tile_bytes > (28 << 20):
        # Raise the ~32 MiB default scoped-VMEM ceiling; cap at v7x's 64 MiB
        # physical VMEM.  (Very large int_dim would additionally need N/K
        # tiling of the weights, which this fully-fused kernel does not do.)
        vmem_limit = min(int((weight_bytes + tile_bytes) * 3 // 2), 64 << 20)

    def run(weight_mode):
        const = lambda i: (0, 0)
        return pl.pallas_call(
            clf_kernel,
            out_shape=jax.ShapeDtypeStruct((Bp, O), x.dtype),
            grid=(Bp // tm,),
            in_specs=[
                pl.BlockSpec((tm, int_dim), lambda i: (i, 0)),      # batch-tiled x
                pl.BlockSpec((int_dim, D), const, pipeline_mode=weight_mode),
                pl.BlockSpec((1, D), const, pipeline_mode=weight_mode),
                pl.BlockSpec((D, O), const, pipeline_mode=weight_mode),
                pl.BlockSpec((1, O), const, pipeline_mode=weight_mode),
            ],
            out_specs=pl.BlockSpec((tm, O), lambda i: (i, 0)),
            compiler_params=pltpu.CompilerParams(
                dimension_semantics=("parallel",),
                vmem_limit_bytes=vmem_limit),
        )(xp, w1p, b1p, w2p, b2p)

    try:
        # Single-buffer the constant (never re-fetched) weight/bias operands.
        # Block inside the try so any lowering issue is caught here and we
        # fall back to default double-buffering instead of failing outright.
        out_padded = jax.block_until_ready(run(pl.Buffered(1)))
    except Exception:
        out_padded = run(None)

    if Bp != B or O != out_dim:
        out_padded = out_padded[:B, :out_dim]
    return out_padded


if __name__ == "__main__":
    # Shapes implied by the forward: x is (batch, int_dim).
    batch, int_dim, out_dim = 8, 32, 16

    key = jax.random.PRNGKey(0)
    kx, k1, kb1, k2, kb2 = jax.random.split(key, 5)

    x = jax.random.normal(kx, (batch, int_dim), dtype=jnp.float32)
    # nn.Linear defaults have bias=True since the ctor's `bias` flag is never
    # forwarded to the Linear layers — so both layers carry a bias here.
    w1 = jax.random.normal(k1, (int_dim, int_dim), dtype=jnp.float32) * 0.1
    b1 = jax.random.normal(kb1, (1, int_dim), dtype=jnp.float32) * 0.1
    w2 = jax.random.normal(k2, (int_dim, out_dim), dtype=jnp.float32) * 0.1
    b2 = jax.random.normal(kb2, (1, out_dim), dtype=jnp.float32) * 0.1

    params = clf_prepare_params(w1, b1, w2, b2)   # one-time pad/cast (hoisted)
    out = clf_forward(x, *params, out_dim)
    out = jax.block_until_ready(out)
    assert out.shape == (batch, out_dim)

    # Reference with the same bf16-input / f32-accumulate recipe (tight check).
    h_ref = jnp.dot(x.astype(jnp.bfloat16), w1.astype(jnp.bfloat16),
                    preferred_element_type=jnp.float32) + b1
    h_ref = jnp.maximum(h_ref, 0.0)
    ref_bf16 = jnp.dot(h_ref.astype(jnp.bfloat16), w2.astype(jnp.bfloat16),
                       preferred_element_type=jnp.float32) + b2
    assert jnp.allclose(out, ref_bf16, atol=1e-3, rtol=1e-3), "mismatch vs bf16 reference"

    # Loose sanity check vs full-f32 math (bf16 MXU inputs lose a few bits).
    ref_f32 = jnp.maximum(x @ w1 + b1, 0.0) @ w2 + b2
    assert jnp.allclose(out, ref_f32, atol=5e-2, rtol=5e-2), "mismatch vs f32 reference"

    print("KERNEL_OK")
</pallas_src>

<mosaic_0001>
module attributes {stable_mosaic.version = 11 : i64} {
  func.func @clf_kernel(%arg0: i32, %arg1: memref<8x32xf32, #tpu.memory_space<vmem>>, %arg2: memref<32x128xbf16, #tpu.memory_space<vmem>>, %arg3: memref<1x128xf32, #tpu.memory_space<vmem>>, %arg4: memref<128x128xbf16, #tpu.memory_space<vmem>>, %arg5: memref<1x128xf32, #tpu.memory_space<vmem>>, %arg6: memref<8x128xf32, #tpu.memory_space<vmem>>) attributes {dimension_semantics = [#tpu.dimension_semantics<parallel>], iteration_bounds = array<i64: 1>, scalar_prefetch = 0 : i64, scratch_operands = 0 : i64, tpu.core_type = #tpu.core_type<tc>, window_params = [{transform_indices = @transform_0, window_bounds = array<i64: 8, 32>}, {pipeline_mode = #tpu.pipeline_mode<synchronous>, transform_indices = @transform_1, window_bounds = array<i64: 32, 128>}, {pipeline_mode = #tpu.pipeline_mode<synchronous>, transform_indices = @transform_2, window_bounds = array<i64: 1, 128>}, {pipeline_mode = #tpu.pipeline_mode<synchronous>, transform_indices = @transform_3, window_bounds = array<i64: 128, 128>}, {pipeline_mode = #tpu.pipeline_mode<synchronous>, transform_indices = @transform_4, window_bounds = array<i64: 1, 128>}, {transform_indices = @transform_5, window_bounds = array<i64: 8, 128>}]} {
    %c0 = arith.constant 0 : index
    %c0_0 = arith.constant 0 : index
    %0 = vector.load %arg1[%c0, %c0_0] : memref<8x32xf32, #tpu.memory_space<vmem>>, vector<8x32xf32>
    %1 = arith.truncf %0 : vector<8x32xf32> to vector<8x32xbf16>
    %c0_1 = arith.constant 0 : index
    %c0_2 = arith.constant 0 : index
    %2 = vector.load %arg2[%c0_1, %c0_2] : memref<32x128xbf16, #tpu.memory_space<vmem>>, vector<32x128xbf16>
    %cst = arith.constant dense<0.000000e+00> : vector<8x128xf32>
    %3 = tpu.matmul %1, %2, %cst {dimension_numbers = #tpu.dot_dimension_numbers<[1], [0], [0], [1], [0, 0, 1, 1], [], []>} : vector<8x32xbf16>, vector<32x128xbf16>, vector<8x128xf32> -> vector<8x128xf32>
    %c0_3 = arith.constant 0 : index
    %c0_4 = arith.constant 0 : index
    %4 = vector.load %arg3[%c0_3, %c0_4] : memref<1x128xf32, #tpu.memory_space<vmem>>, vector<1x128xf32>
    %5 = vector.broadcast %4 : vector<1x128xf32> to vector<8x128xf32>
    %6 = arith.addf %3, %5 : vector<8x128xf32>
    %cst_5 = arith.constant 0.000000e+00 : f32
    %7 = vector.broadcast %cst_5 : f32 to vector<8x128xf32>
    %8 = arith.maximumf %6, %7 : vector<8x128xf32>
    %9 = arith.truncf %8 : vector<8x128xf32> to vector<8x128xbf16>
    %c0_6 = arith.constant 0 : index
    %c0_7 = arith.constant 0 : index
    %10 = vector.load %arg4[%c0_6, %c0_7] : memref<128x128xbf16, #tpu.memory_space<vmem>>, vector<128x128xbf16>
    %cst_8 = arith.constant dense<0.000000e+00> : vector<8x128xf32>
    %11 = tpu.matmul %9, %10, %cst_8 {dimension_numbers = #tpu.dot_dimension_numbers<[1], [0], [0], [1], [0, 0, 1, 1], [], []>} : vector<8x128xbf16>, vector<128x128xbf16>, vector<8x128xf32> -> vector<8x128xf32>
    %c0_9 = arith.constant 0 : index
    %c0_10 = arith.constant 0 : index
    %12 = vector.load %arg5[%c0_9, %c0_10] : memref<1x128xf32, #tpu.memory_space<vmem>>, vector<1x128xf32>
    %13 = vector.broadcast %12 : vector<1x128xf32> to vector<8x128xf32>
    %14 = arith.addf %11, %13 : vector<8x128xf32>
    %c0_11 = arith.constant 0 : index
    %c0_12 = arith.constant 0 : index
    %15 = vector.load %arg6[%c0_11, %c0_12] : memref<8x128xf32, #tpu.memory_space<vmem>>, vector<8x128xf32>
    tpu.vector_store %arg6[%c0_11, %c0_12], %14 {strides = array<i32>} : memref<8x128xf32, #tpu.memory_space<vmem>>, vector<8x128xf32>,
    return
  }
  func.func @transform_0(%arg0: i32) -> (i32, i32) {
    %c0_i32 = arith.constant 0 : i32
    %c0_i32_0 = arith.constant 0 : i32
    return %arg0, %c0_i32 : i32, i32
  }
  func.func @transform_1(%arg0: i32) -> (i32, i32) {
    %c0_i32 = arith.constant 0 : i32
    %c0_i32_0 = arith.constant 0 : i32
    %c0_i32_1 = arith.constant 0 : i32
    return %c0_i32, %c0_i32_0 : i32, i32
  }
  func.func @transform_2(%arg0: i32) -> (i32, i32) {
    %c0_i32 = arith.constant 0 : i32
    %c0_i32_0 = arith.constant 0 : i32
    %c0_i32_1 = arith.constant 0 : i32
    return %c0_i32, %c0_i32_0 : i32, i32
  }
  func.func @transform_3(%arg0: i32) -> (i32, i32) {
    %c0_i32 = arith.constant 0 : i32
    %c0_i32_0 = arith.constant 0 : i32
    %c0_i32_1 = arith.constant 0 : i32
    return %c0_i32, %c0_i32_0 : i32, i32
  }
  func.func @transform_4(%arg0: i32) -> (i32, i32) {
    %c0_i32 = arith.constant 0 : i32
    %c0_i32_0 = arith.constant 0 : i32
    %c0_i32_1 = arith.constant 0 : i32
    return %c0_i32, %c0_i32_0 : i32, i32
  }
  func.func @transform_5(%arg0: i32) -> (i32, i32) {
    %c0_i32 = arith.constant 0 : i32
    %c0_i32_0 = arith.constant 0 : i32
    return %arg0, %c0_i32 : i32, i32
  }
}

module attributes {stable_mosaic.version = 11 : i64} {
  func.func @clf_kernel(%arg0: i32, %arg1: memref<8x32xf32, #tpu.memory_space<vmem>>, %arg2: memref<32x128xbf16, #tpu.memory_space<vmem>>, %arg3: memref<1x128xf32, #tpu.memory_space<vmem>>, %arg4: memref<128x128xbf16, #tpu.memory_space<vmem>>, %arg5: memref<1x128xf32, #tpu.memory_space<vmem>>, %arg6: memref<8x128xf32, #tpu.memory_space<vmem>>) attributes {dimension_semantics = [#tpu.dimension_semantics<parallel>], iteration_bounds = array<i64: 1>, scalar_prefetch = 0 : i64, scratch_operands = 0 : i64, tpu.core_type = #tpu.core_type<tc>, window_params = [{transform_indices = @transform_0, window_bounds = array<i64: 8, 32>}, {pipeline_mode = #tpu.pipeline_mode<synchronous>, transform_indices = @transform_1, window_bounds = array<i64: 32, 128>}, {pipeline_mode = #tpu.pipeline_mode<synchronous>, transform_indices = @transform_2, window_bounds = array<i64: 1, 128>}, {pipeline_mode = #tpu.pipeline_mode<synchronous>, transform_indices = @transform_3, window_bounds = array<i64: 128, 128>}, {pipeline_mode = #tpu.pipeline_mode<synchronous>, transform_indices = @transform_4, window_bounds = array<i64: 1, 128>}, {transform_indices = @transform_5, window_bounds = array<i64: 8, 128>}]} {
    %c0 = arith.constant 0 : index
    %c0_0 = arith.constant 0 : index
    %0 = vector.load %arg1[%c0, %c0_0] : memref<8x32xf32, #tpu.memory_space<vmem>>, vector<8x32xf32>
    %1 = arith.truncf %0 : vector<8x32xf32> to vector<8x32xbf16>
    %c0_1 = arith.constant 0 : index
    %c0_2 = arith.constant 0 : index
    %2 = vector.load %arg2[%c0_1, %c0_2] : memref<32x128xbf16, #tpu.memory_space<vmem>>, vector<32x128xbf16>
    %cst = arith.constant dense<0.000000e+00> : vector<8x128xf32>
    %3 = tpu.matmul %1, %2, %cst {dimension_numbers = #tpu.dot_dimension_numbers<[1], [0], [0], [1], [0, 0, 1, 1], [], []>} : vector<8x32xbf16>, vector<32x128xbf16>, vector<8x128xf32> -> vector<8x128xf32>
    %c0_3 = arith.constant 0 : index
    %c0_4 = arith.constant 0 : index
    %4 = vector.load %arg3[%c0_3, %c0_4] : memref<1x128xf32, #tpu.memory_space<vmem>>, vector<1x128xf32>
    %5 = vector.broadcast %4 : vector<1x128xf32> to vector<8x128xf32>
    %6 = arith.addf %3, %5 : vector<8x128xf32>
    %cst_5 = arith.constant 0.000000e+00 : f32
    %7 = vector.broadcast %cst_5 : f32 to vector<8x128xf32>
    %8 = arith.maximumf %6, %7 : vector<8x128xf32>
    %9 = arith.truncf %8 : vector<8x128xf32> to vector<8x128xbf16>
    %c0_6 = arith.constant 0 : index
    %c0_7 = arith.constant 0 : index
    %10 = vector.load %arg4[%c0_6, %c0_7] : memref<128x128xbf16, #tpu.memory_space<vmem>>, vector<128x128xbf16>
    %cst_8 = arith.constant dense<0.000000e+00> : vector<8x128xf32>
    %11 = tpu.matmul %9, %10, %cst_8 {dimension_numbers = #tpu.dot_dimension_numbers<[1], [0], [0], [1], [0, 0, 1, 1], [], []>} : vector<8x128xbf16>, vector<128x128xbf16>, vector<8x128xf32> -> vector<8x128xf32>
    %c0_9 = arith.constant 0 : index
    %c0_10 = arith.constant 0 : index
    %12 = vector.load %arg5[%c0_9, %c0_10] : memref<1x128xf32, #tpu.memory_space<vmem>>, vector<1x128xf32>
    %13 = vector.broadcast %12 : vector<1x128xf32> to vector<8x128xf32>
    %14 = arith.addf %11, %13 : vector<8x128xf32>
    %c0_11 = arith.constant 0 : index
    %c0_12 = arith.constant 0 : index
    %15 = vector.load %arg6[%c0_11, %c0_12] : memref<8x128xf32, #tpu.memory_space<vmem>>, vector<8x128xf32>
    tpu.vector_store %arg6[%c0_11, %c0_12], %14 {strides = array<i32>} : memref<8x128xf32, #tpu.memory_space<vmem>>, vector<8x128xf32>,
    return
  }
  func.func @transform_0(%arg0: i32) -> (i32, i32) {
    %c0_i32 = arith.constant 0 : i32
    %c0_i32_0 = arith.constant 0 : i32
    return %arg0, %c0_i32 : i32, i32
  }
  func.func @transform_1(%arg0: i32) -> (i32, i32) {
    %c0_i32 = arith.constant 0 : i32
    %c0_i32_0 = arith.constant 0 : i32
    %c0_i32_1 = arith.constant 0 : i32
    return %c0_i32, %c0_i32_0 : i32, i32
  }
  func.func @transform_2(%arg0: i32) -> (i32, i32) {
    %c0_i32 = arith.constant 0 : i32
    %c0_i32_0 = arith.constant 0 : i32
    %c0_i32_1 = arith.constant 0 : i32
    return %c0_i32, %c0_i32_0 : i32, i32
  }
  func.func @transform_3(%arg0: i32) -> (i32, i32) {
    %c0_i32 = arith.constant 0 : i32
    %c0_i32_0 = arith.constant 0 : i32
    %c0_i32_1 = arith.constant 0 : i32
    return %c0_i32, %c0_i32_0 : i32, i32
  }
  func.func @transform_4(%arg0: i32) -> (i32, i32) {
    %c0_i32 = arith.constant 0 : i32
    %c0_i32_0 = arith.constant 0 : i32
    %c0_i32_1 = arith.constant 0 : i32
    return %c0_i32, %c0_i32_0 : i32, i32
  }
  func.func @transform_5(%arg0: i32) -> (i32, i32) {
    %c0_i32 = arith.constant 0 : i32
    %c0_i32_0 = arith.constant 0 : i32
    return %arg0, %c0_i32 : i32, i32
  }
}

</mosaic_0001>

<bundles_post_ra>
// kernel: tpu_custom_call.1
= control target key start
LH: loop header
LB: loop body
LE: loop exit
PB: predicated region body
PF: predicated region fallthrough
CT: control target
= control target key end

     0   :  { %10 = vsyncpa [#allocation3], 0  ;;  %s473_s0 = inlined_call_operand.hbm [shape: f32[8,32], index: 0, kind: input, shape index: {}]   ;;  %s474_s1 = inlined_call_operand.hbm [shape: bf16[32,128], index: 1, kind: input, shape index: {}]   ;;  %s475_s2 = inlined_call_operand.vmem [shape: f32[1,128], index: 2, kind: input, shape index: {}]   ;;  %s476_s3 = inlined_call_operand.hbm [shape: bf16[128,128], index: 3, kind: input, shape index: {}]   ;;  %s477_s4 = inlined_call_operand.vmem [shape: f32[1,128], index: 4, kind: input, shape index: {}]   ;;  %s478_s5 = inlined_call_operand.hbm [shape: f32[8,128], index: 5, kind: output, shape index: {}]  }
   0x1   :  { %11 = vsyncpa [#allocation6], 0 }
   0x2   :  { %12 = vsyncpa [#allocation4], 0  ;;  %s417_s18 = smov [#allocation5]  }
   0x3   :  { %s28_s19 = sshll.u32 %s417_s18, 4  ;;  %s29_s19 = int_to_ptr.vmem [resolvable:$true] %s28_s19 }
   0x4   :  { %s339_s20 = scalar_lea.vmem %s29_s19, 256  ;;  %p344_p1 = scmp.lt.s32.totalorder %s29_s19, %s29_s19 }
   0x5   :  { %p340_p0 = scmp.ne.s32.totalorder %s29_s19, %s339_s20  ;;  %p345_p2 = scmp.lt.s32.totalorder %s339_s20, %s339_s20 }
   0x7   :  { %p346_p3 = por %p345_p2, %p344_p1 }
   0x9   :  { %p347_p4 = pnand %p346_p3, %p340_p0 }
   0xb   :  { %350 = shalt.err (!%p347_p4)
}
   0xc   :  { %s418_s21 = smov 64   ;;  %s419_s22 = smov 4  }
   0xd   :  { %34 = dma.hbm_to_vmem [thread:$0]  %s474_s1, 256, %s29_s19, [#allocation6], %s418_s21, %s418_s21, %s419_s22  }
   0xe   :  { %s420_s25 = smov [#allocation2]   ;;  %s421_s27 = smov [#allocation7]  }
   0xf   :  { %s19_s26 = sshll.u32 %s420_s25, 4  ;;  %s42_s28 = sshll.u32 %s421_s27, 4  ;;  %s20_s26 = int_to_ptr.vmem [resolvable:$true] %s19_s26  ;;  %s43_s28 = int_to_ptr.vmem [resolvable:$true] %s42_s28 }
  0x10   :  { %s359_s29 = scalar_lea.vmem %s20_s26, 128  ;;  %p364_p6 = scmp.lt.s32.totalorder %s20_s26, %s20_s26 }
  0x11   :  { %p360_p5 = scmp.ne.s32.totalorder %s20_s26, %s359_s29  ;;  %p365_p7 = scmp.lt.s32.totalorder %s359_s29, %s359_s29 }
  0x13   :  { %p366_p8 = por %p365_p7, %p364_p6 }
  0x15   :  { %p367_p9 = pnand %p366_p8, %p360_p5 }
  0x17   :  { %370 = shalt.err (!%p367_p9)
}
  0x18   :  { %22 = dma.hbm_to_vmem [thread:$0]  %s473_s0, 128, %s20_s26, [#allocation3]  }
  0x19   :  { %s379_s7 = scalar_lea.vmem %s43_s28, 1024  ;;  %p384_p11 = scmp.lt.s32.totalorder %s43_s28, %s43_s28 }
  0x1a   :  { %p380_p10 = scmp.ne.s32.totalorder %s43_s28, %s379_s7  ;;  %p385_p12 = scmp.lt.s32.totalorder %s379_s7, %s379_s7 }
  0x1c   :  { %p386_p13 = por %p385_p12, %p384_p11 }
  0x1e   :  { %p387_p0 = pnand %p386_p13, %p380_p10 }
  0x20   :  { %390 = shalt.err (!%p387_p0)
}
  0x21   :  { %48 = dma.hbm_to_vmem [thread:$0]  %s476_s3, 1024, %s43_s28, [#allocation6], %s418_s21, %s418_s21, %s419_s22  }
  0x22   :  { %411 = dma.done.wait [#allocation3], 128  }
  0x23   :  { %412 = vsyncadd [#allocation3], 4294967168 }
  0x24   :  { %413 = dma.done.wait [#allocation6], 1280  }
  0x25   :  { %414 = vsyncadd [#allocation6], 4294966016  ;;  %v422_v0 = vmov 0.0   ;;  %vm423_vm0 = vmmov 0   ;;  %v321_v1 = vld [vmem:[#allocation5 + $0x8] sm:$0xff]   ;;  %v322_v2 = vld [vmem:[#allocation5] sm:$0xff]  }
  0x26   :  { %285 = vmatprep.subr.bf16.mxu0 %v422_v0  ;;  %289 = vmatprep.mubr.msk.bf16.mxu0 %vm423_vm0, %v422_v0  ;;  %v61_v3 = vld [vmem:[#allocation2] sm:$0xff]  ;;  %v323_v4 = vld [vmem:[#allocation7 + $0x38] sm:$0xff]   ;;  %v324_v6 = vld [vmem:[#allocation7 + $0x30] sm:$0xff]   ;;  %vm86_vm1 = vcmask 261120   ;;  %s424_s11 = smov [#allocation8]  }
  0x27   :  { %293 = vmatprep.subr.bf16.mxu1 %v422_v0  ;;  %309 = vmatprep.mubr.msk.bf16.mxu1 %vm423_vm0, %v422_v0  ;;  %v62_v5 = vpack.c.bf16 %v61_v3, %v61_v3  ;;  %v325_v7 = vld [vmem:[#allocation7 + $0x28] sm:$0xff]   ;;  %v326_v8 = vld [vmem:[#allocation7 + $0x20] sm:$0xff]   ;;  %v327_v9 = vld [vmem:[#allocation7 + $0x18] sm:$0xff]   ;;  %s250_s12 = sshll.u32 %s424_s11, 4  ;;  %s251_s12 = int_to_ptr.vmem [resolvable:$true] %s250_s12 }
  0x28   :  { %286 = vmatpush3.bf16.msra.mxu0 %v321_v1  ;;  %294 = vmatpush3.bf16.msra.mxu1 %v323_v4  ;;  %v328_v10 = vld [vmem:[#allocation7 + $0x10] sm:$0xff]   ;;  %v329_v11 = vld [vmem:[#allocation7 + $0x8] sm:$0xff]   ;;  %v330_v12 = vld [vmem:[#allocation7] sm:$0xff]   ;;  %p396_p2 = scmp.lt.s32.totalorder %s251_s12, %s251_s12 }
  0x29   :  { %287 = vmatprep.subr.bf16.mxu0 %v422_v0  ;;  %295 = vmatprep.subr.bf16.mxu1 %v422_v0  ;;  %v260_v13 = vld [vmem:[%s475_s2] ss:$0 sm:$0xff]  ;;  %s391_s2 = scalar_lea.vmem %s251_s12, 128 }
  0x2a   :  { %v264_v21 = vld [vmem:[%s477_s4] ss:$0 sm:$0xff]  ;;  %p392_p1 = scmp.ne.s32.totalorder %s251_s12, %s391_s2  ;;  %p397_p3 = scmp.lt.s32.totalorder %s391_s2, %s391_s2 }
  0x2c   :  { %288 = vmatpush3.bf16.msra.mxu0 %v322_v2  ;;  %296 = vmatpush3.bf16.msra.mxu1 %v324_v6  ;;  %p398_p4 = por %p397_p3, %p396_p2 }
  0x2d   :  { %297 = vmatprep.subr.bf16.mxu1 %v422_v0 }
  0x2e   :  { %p399_p5 = pnand %p398_p4, %p392_p1 }
  0x2f   :  { %290 = vmatmul.mubr.msk.bf16.vlgmr.msra.gmra.mxu0 %vm86_vm1, %v62_v5 }
  0x30   :  { %298 = vmatpush3.bf16.msra.mxu1 %v325_v7 }
  0x31   :  { %299 = vmatprep.subr.bf16.mxu1 %v422_v0 }
  0x34   :  { %300 = vmatpush3.bf16.msra.mxu1 %v326_v8 }
  0x35   :  { %301 = vmatprep.subr.bf16.mxu1 %v422_v0 }
  0x38   :  { %302 = vmatpush3.bf16.msra.mxu1 %v327_v9 }
  0x39   :  { %303 = vmatprep.subr.bf16.mxu1 %v422_v0 }
  0x3c   :  { %304 = vmatpush3.bf16.msra.mxu1 %v328_v10 }
  0x3d   :  { %305 = vmatprep.subr.bf16.mxu1 %v422_v0 }
  0x40   :  { %306 = vmatpush3.bf16.msra.mxu1 %v329_v11 }
  0x41   :  { %307 = vmatprep.subr.bf16.mxu1 %v422_v0 }
  0x44   :  { %308 = vmatpush3.bf16.msra.mxu1 %v330_v12 }
  0xef   :  { %v124_v14 = vpop.f32.mrf.mxu0 }
  0xf0   :  { %v125_v15 = vadd.f32 %v260_v13, %v124_v14 }
  0xf1   :  { %v291_v16 = vpop.f32.mrf.mxu0 }
  0xf2   :  { %v130_v17 = vmax.f32 %v125_v15, 0.0 }
  0xf3   :  { %v127_v18 = vpop.f32.mrf.mxu0 }
  0xf4   :  { %v131_v19 = vpack.c.bf16 %v130_v17, %v130_v17 }
  0xf5   :  { %v292_v20 = vpop.f32.mrf.mxu0 }
  0xf6   :  { %310 = vmatmul.mubr.bf16.vlgmr.msra.gmra.mxu1 %v131_v19 }
 0x1b6   :  { %v237_v22 = vpop.f32.mrf.mxu1 }
 0x1b7   :  { %v238_v23 = vadd.f32 %v264_v21, %v237_v22 }
 0x1b8   :  { %v311_v24 = vpop.f32.mrf.mxu1 }
 0x1b9   :  { %243 = vst [vmem:[#allocation8] sm:$0xff] %v238_v23 }
 0x1ba   :  { %v240_v25 = vpop.f32.mrf.mxu1 }
 0x1bb   :  { %402 = shalt.err (!%p399_p5)
}
 0x1bc   :  { %253 = dma.vmem_to_hbm [thread:$0]  %s251_s12, 128, %s478_s5, [#allocation4]   ;;  %v312_v26 = vpop.f32.mrf.mxu1 }
 0x1bd   :  { %415 = dma.done.wait [#allocation4], 128  }
 0x1be   :  { %416 = vsyncadd [#allocation4], 4294967168 }
 0x1bf   :  { %257 = vsyncpa [#allocation3], 1 }
 0x1c0   :  { %258 = vsyncpa [#allocation6], 1 }
 0x1c1   :  { %259 = vsyncpa [#allocation4], 1 }

// kernel: tpu_custom_call.1
= control target key start
LH: loop header
LB: loop body
LE: loop exit
PB: predicated region body
PF: predicated region fallthrough
CT: control target
= control target key end

     0   :  { %10 = vsyncpa [#allocation3], 0  ;;  %s473_s0 = inlined_call_operand.hbm [shape: f32[8,32], index: 0, kind: input, shape index: {}]   ;;  %s474_s1 = inlined_call_operand.hbm [shape: bf16[32,128], index: 1, kind: input, shape index: {}]   ;;  %s475_s2 = inlined_call_operand.vmem [shape: f32[1,128], index: 2, kind: input, shape index: {}]   ;;  %s476_s3 = inlined_call_operand.hbm [shape: bf16[128,128], index: 3, kind: input, shape index: {}]   ;;  %s477_s4 = inlined_call_operand.vmem [shape: f32[1,128], index: 4, kind: input, shape index: {}]   ;;  %s478_s5 = inlined_call_operand.hbm [shape: f32[8,128], index: 5, kind: output, shape index: {}]  }
   0x1   :  { %11 = vsyncpa [#allocation6], 0 }
   0x2   :  { %12 = vsyncpa [#allocation4], 0  ;;  %s417_s18 = smov [#allocation5]  }
   0x3   :  { %s28_s19 = sshll.u32 %s417_s18, 4  ;;  %s29_s19 = int_to_ptr.vmem [resolvable:$true] %s28_s19 }
   0x4   :  { %s339_s20 = scalar_lea.vmem %s29_s19, 256  ;;  %p344_p1 = scmp.lt.s32.totalorder %s29_s19, %s29_s19 }
   0x5   :  { %p340_p0 = scmp.ne.s32.totalorder %s29_s19, %s339_s20  ;;  %p345_p2 = scmp.lt.s32.totalorder %s339_s20, %s339_s20 }
   0x7   :  { %p346_p3 = por %p345_p2, %p344_p1 }
   0x9   :  { %p347_p4 = pnand %p346_p3, %p340_p0 }
   0xb   :  { %350 = shalt.err (!%p347_p4)
}
   0xc   :  { %s418_s21 = smov 64   ;;  %s419_s22 = smov 4  }
   0xd   :  { %34 = dma.hbm_to_vmem [thread:$0]  %s474_s1, 256, %s29_s19, [#allocation6], %s418_s21, %s418_s21, %s419_s22  }
   0xe   :  { %s420_s25 = smov [#allocation2]   ;;  %s421_s27 = smov [#allocation7]  }
   0xf   :  { %s19_s26 = sshll.u32 %s420_s25, 4  ;;  %s42_s28 = sshll.u32 %s421_s27, 4  ;;  %s20_s26 = int_to_ptr.vmem [resolvable:$true] %s19_s26  ;;  %s43_s28 = int_to_ptr.vmem [resolvable:$true] %s42_s28 }
  0x10   :  { %s359_s29 = scalar_lea.vmem %s20_s26, 128  ;;  %p364_p6 = scmp.lt.s32.totalorder %s20_s26, %s20_s26 }
  0x11   :  { %p360_p5 = scmp.ne.s32.totalorder %s20_s26, %s359_s29  ;;  %p365_p7 = scmp.lt.s32.totalorder %s359_s29, %s359_s29 }
  0x13   :  { %p366_p8 = por %p365_p7, %p364_p6 }
  0x15   :  { %p367_p9 = pnand %p366_p8, %p360_p5 }
  0x17   :  { %370 = shalt.err (!%p367_p9)
}
  0x18   :  { %22 = dma.hbm_to_vmem [thread:$0]  %s473_s0, 128, %s20_s26, [#allocation3]  }
  0x19   :  { %s379_s7 = scalar_lea.vmem %s43_s28, 1024  ;;  %p384_p11 = scmp.lt.s32.totalorder %s43_s28, %s43_s28 }
  0x1a   :  { %p380_p10 = scmp.ne.s32.totalorder %s43_s28, %s379_s7  ;;  %p385_p12 = scmp.lt.s32.totalorder %s379_s7, %s379_s7 }
  0x1c   :  { %p386_p13 = por %p385_p12, %p384_p11 }
  0x1e   :  { %p387_p0 = pnand %p386_p13, %p380_p10 }
  0x20   :  { %390 = shalt.err (!%p387_p0)
}
  0x21   :  { %48 = dma.hbm_to_vmem [thread:$0]  %s476_s3, 1024, %s43_s28, [#allocation6], %s418_s21, %s418_s21, %s419_s22  }
  0x22   :  { %411 = dma.done.wait [#allocation3], 128  }
  0x23   :  { %412 = vsyncadd [#allocation3], 4294967168 }
  0x24   :  { %413 = dma.done.wait [#allocation6], 1280  }
  0x25   :  { %414 = vsyncadd [#allocation6], 4294966016  ;;  %v422_v0 = vmov 0.0   ;;  %vm423_vm0 = vmmov 0   ;;  %v321_v1 = vld [vmem:[#allocation5 + $0x8] sm:$0xff]   ;;  %v322_v2 = vld [vmem:[#allocation5] sm:$0xff]  }
  0x26   :  { %285 = vmatprep.subr.bf16.mxu0 %v422_v0  ;;  %289 = vmatprep.mubr.msk.bf16.mxu0 %vm423_vm0, %v422_v0  ;;  %v61_v3 = vld [vmem:[#allocation2] sm:$0xff]  ;;  %v323_v4 = vld [vmem:[#allocation7 + $0x38] sm:$0xff]   ;;  %v324_v6 = vld [vmem:[#allocation7 + $0x30] sm:$0xff]   ;;  %vm86_vm1 = vcmask 261120   ;;  %s424_s11 = smov [#allocation8]  }
  0x27   :  { %293 = vmatprep.subr.bf16.mxu1 %v422_v0  ;;  %309 = vmatprep.mubr.msk.bf16.mxu1 %vm423_vm0, %v422_v0  ;;  %v62_v5 = vpack.c.bf16 %v61_v3, %v61_v3  ;;  %v325_v7 = vld [vmem:[#allocation7 + $0x28] sm:$0xff]   ;;  %v326_v8 = vld [vmem:[#allocation7 + $0x20] sm:$0xff]   ;;  %v327_v9 = vld [vmem:[#allocation7 + $0x18] sm:$0xff]   ;;  %s250_s12 = sshll.u32 %s424_s11, 4  ;;  %s251_s12 = int_to_ptr.vmem [resolvable:$true] %s250_s12 }
  0x28   :  { %286 = vmatpush3.bf16.msra.mxu0 %v321_v1  ;;  %294 = vmatpush3.bf16.msra.mxu1 %v323_v4  ;;  %v328_v10 = vld [vmem:[#allocation7 + $0x10] sm:$0xff]   ;;  %v329_v11 = vld [vmem:[#allocation7 + $0x8] sm:$0xff]   ;;  %v330_v12 = vld [vmem:[#allocation7] sm:$0xff]   ;;  %p396_p2 = scmp.lt.s32.totalorder %s251_s12, %s251_s12 }
  0x29   :  { %287 = vmatprep.subr.bf16.mxu0 %v422_v0  ;;  %295 = vmatprep.subr.bf16.mxu1 %v422_v0  ;;  %v260_v13 = vld [vmem:[%s475_s2] ss:$0 sm:$0xff]  ;;  %s391_s2 = scalar_lea.vmem %s251_s12, 128 }
  0x2a   :  { %v264_v21 = vld [vmem:[%s477_s4] ss:$0 sm:$0xff]  ;;  %p392_p1 = scmp.ne.s32.totalorder %s251_s12, %s391_s2  ;;  %p397_p3 = scmp.lt.s32.totalorder %s391_s2, %s391_s2 }
  0x2c   :  { %288 = vmatpush3.bf16.msra.mxu0 %v322_v2  ;;  %296 = vmatpush3.bf16.msra.mxu1 %v324_v6  ;;  %p398_p4 = por %p397_p3, %p396_p2 }
  0x2d   :  { %297 = vmatprep.subr.bf16.mxu1 %v422_v0 }
  0x2e   :  { %p399_p5 = pnand %p398_p4, %p392_p1 }
  0x2f   :  { %290 = vmatmul.mubr.msk.bf16.vlgmr.msra.gmra.mxu0 %vm86_vm1, %v62_v5 }
  0x30   :  { %298 = vmatpush3.bf16.msra.mxu1 %v325_v7 }
  0x31   :  { %299 = vmatprep.subr.bf16.mxu1 %v422_v0 }
  0x34   :  { %300 = vmatpush3.bf16.msra.mxu1 %v326_v8 }
  0x35   :  { %301 = vmatprep.subr.bf16.mxu1 %v422_v0 }
  0x38   :  { %302 = vmatpush3.bf16.msra.mxu1 %v327_v9 }
  0x39   :  { %303 = vmatprep.subr.bf16.mxu1 %v422_v0 }
  0x3c   :  { %304 = vmatpush3.bf16.msra.mxu1 %v328_v10 }
  0x3d   :  { %305 = vmatprep.subr.bf16.mxu1 %v422_v0 }
  0x40   :  { %306 = vmatpush3.bf16.msra.mxu1 %v329_v11 }
  0x41   :  { %307 = vmatprep.subr.bf16.mxu1 %v422_v0 }
  0x44   :  { %308 = vmatpush3.bf16.msra.mxu1 %v330_v12 }
  0xef   :  { %v124_v14 = vpop.f32.mrf.mxu0 }
  0xf0   :  { %v125_v15 = vadd.f32 %v260_v13, %v124_v14 }
  0xf1   :  { %v291_v16 = vpop.f32.mrf.mxu0 }
  0xf2   :  { %v130_v17 = vmax.f32 %v125_v15, 0.0 }
  0xf3   :  { %v127_v18 = vpop.f32.mrf.mxu0 }
  0xf4   :  { %v131_v19 = vpack.c.bf16 %v130_v17, %v130_v17 }
  0xf5   :  { %v292_v20 = vpop.f32.mrf.mxu0 }
  0xf6   :  { %310 = vmatmul.mubr.bf16.vlgmr.msra.gmra.mxu1 %v131_v19 }
 0x1b6   :  { %v237_v22 = vpop.f32.mrf.mxu1 }
 0x1b7   :  { %v238_v23 = vadd.f32 %v264_v21, %v237_v22 }
 0x1b8   :  { %v311_v24 = vpop.f32.mrf.mxu1 }
 0x1b9   :  { %243 = vst [vmem:[#allocation8] sm:$0xff] %v238_v23 }
 0x1ba   :  { %v240_v25 = vpop.f32.mrf.mxu1 }
 0x1bb   :  { %402 = shalt.err (!%p399_p5)
}
 0x1bc   :  { %253 = dma.vmem_to_hbm [thread:$0]  %s251_s12, 128, %s478_s5, [#allocation4]   ;;  %v312_v26 = vpop.f32.mrf.mxu1 }
 0x1bd   :  { %415 = dma.done.wait [#allocation4], 128  }
 0x1be   :  { %416 = vsyncadd [#allocation4], 4294967168 }
 0x1bf   :  { %257 = vsyncpa [#allocation3], 1 }
 0x1c0   :  { %258 = vsyncpa [#allocation6], 1 }
 0x1c1   :  { %259 = vsyncpa [#allocation4], 1 }

</bundles_post_ra>
